<compile_context>
chip_gen: v5e
topology: v5e:2x2
jax: 0.10.0
libtpu: 0.0.40
codegen_flags: <defaults>
</compile_context>

<pallas_src>
import jax
import jax.numpy as jnp
from jax.experimental import pallas as pl
from jax.experimental.pallas import tpu as pltpu


def _total_model_kernel(xin_ref, gbig_ref, wsel_ref, qden_ref, ab_ref, cst_ref,
                        rw_ref, ftop_ref, mexp_ref, ssel_ref, o_ref):
    f32 = jnp.float32
    x = xin_ref[...]                                   # (TB, 128): [x_last | Z | 0]

    # Per-model one-step forecast of x_last (off the critical chain).
    xp = jnp.dot(x, ftop_ref[...], preferred_element_type=f32)            # (TB, M*D)

    # Forecast-and-difference over the whole window, all models at once (MXU).
    # lanes of diff: (w, m, e)
    diff = jnp.dot(x, gbig_ref[...], preferred_element_type=f32)          # (TB, W*M*D)

    # Conv_Wight-weighted squared prediction error per (model, window step),
    # duplicated over two identical lane halves (so the FLS quadratic form can
    # be fed [score^2 | score] later without any lane concatenation).
    # lanes: (half, m, w); eps guards rtn == 0 and zero-padded batch rows.
    ssq = jnp.dot(diff * diff, wsel_ref[...], preferred_element_type=f32) + 1e-30

    # softmax_m(-log(sqrt(ssq)))  ==  rsqrt(ssq) / sum_m rsqrt(ssq)
    # (exact divide here: this is the error-amplifying path — review concern #3)
    inv = jax.lax.rsqrt(ssq)
    den = jnp.dot(inv, qden_ref[...], preferred_element_type=f32)         # (TB, 2*M*W)
    score2 = inv / den                                                    # [score|score]

    # Zero-order TSK FLS (Gaussian memberships) as ONE quadratic-form matmul:
    #   lhs = [score^2 | score],  e = lhs @ [A ; -2B] + c
    half = score2.shape[-1] // 2
    col = jax.lax.broadcasted_iota(jnp.int32, score2.shape, 1)
    lhs = score2 * jnp.where(col < half, score2, 1.0)                     # (TB, 2*M*W)
    e = jnp.dot(lhs, ab_ref[...], preferred_element_type=f32) + cst_ref[...]
    # Clamp so sum_r exp(-e) can never underflow to 0 (review concern #1);
    # inactive for any reasonable widths (e <= ~30 in practice).
    fire = jnp.exp(-jnp.minimum(e, 80.0))                                 # (TB, M*R)

    # Fused numerator/denominator: nd = fire @ [rule_w | ones]  -> (TB, 2M)
    nd = jnp.dot(fire, rw_ref[...], preferred_element_type=f32)
    m_sz = nd.shape[-1] // 2
    fls_out = nd[:, :m_sz] * pl.reciprocal(nd[:, m_sz:], approx=True)     # (TB, M)

    # softmax over the model axis
    mx = jnp.max(fls_out, axis=-1, keepdims=True)
    ex = jnp.exp(fls_out - mx)
    match = ex * pl.reciprocal(jnp.sum(ex, axis=-1, keepdims=True), approx=True)

    # Blend the per-model one-step forecasts of x_last; lane-dense (TB, 128) store.
    mex = jnp.dot(match, mexp_ref[...], preferred_element_type=f32)       # (TB, M*D)
    o_ref[...] = jnp.dot(mex * xp, ssel_ref[...],
                         preferred_element_type=f32).astype(o_ref.dtype)  # (TB, 128)


def _round_up(x, m):
    return ((x + m - 1) // m) * m


def total_model_forward(x_last, Zs, F, conv_w, fls_c, fls_s, fls_w,
                        *, batch_tile=512, use_bf16=False):
    """x_last: (B, D); Zs: (B, D, W+1) -> (B, 1, D), matching TotalModel.forward."""
    f32 = jnp.float32
    B, D = x_last.shape
    M = F.shape[0]
    T1 = Zs.shape[-1]
    W = T1 - 1
    R = fls_c.shape[0]
    MW = M * W
    LANE = 128
    assert D + T1 * D <= LANE, "merged input slab must fit one 128-lane tile"
    # TODO(synk): for larger D*(W+1) widen the slab to the next multiple of 128.

    # ---- batch tile sizing (big tiles; keep >=2 grid steps for v7x megacore) ----
    TB = max(8, (min(int(batch_tile), _round_up(B, 8)) // 8) * 8)
    if TB >= 16 and _round_up(B, TB) == TB:
        TB = max(8, _round_up((TB + 1) // 2, 8))
    Bp = _round_up(B, TB)

    # ---- merged lane-dense input slab: [x_last | Z(t=0..W, d) | zero pad] ----
    Zt = jnp.swapaxes(Zs.astype(f32), -1, -2).reshape(B, T1 * D)        # (B, (W+1)*D)
    slab = jnp.zeros((Bp, LANE), f32)
    slab = slab.at[:B, :D].set(x_last.astype(f32))
    slab = slab.at[:B, D:D + T1 * D].set(Zt)

    eyeD = jnp.eye(D, dtype=f32)
    eyeM = jnp.eye(M, dtype=f32)
    eyeW = jnp.eye(W, dtype=f32)

    # Fcols[d, m*D + e] = F[m, e, d]   (columns of the per-model transition)
    Fcols = jnp.transpose(F.astype(f32), (2, 0, 1)).reshape(D, M * D)
    negI = -jnp.tile(eyeD, (1, M))                                      # [d, m*D+e] = -δ_de

    # forecast-and-difference operator acting directly on the (W+1)*D slab layout:
    #   diff[(w,m,e)] = (F_m Z_w)_e - Z_{w+1,e}
    Gbig = jnp.zeros((LANE, W * M * D), f32)
    for t in range(W):
        r0 = D + t * D
        Gbig = Gbig.at[r0:r0 + D, t * M * D:(t + 1) * M * D].add(Fcols)
        Gbig = Gbig.at[r0 + D:r0 + 2 * D, t * M * D:(t + 1) * M * D].add(negI)
    # NOTE: Gbig is block-banded; if W grows past ~16 fold the window into the
    # sublane/batch dim ((TB*W, 2D) @ G0) instead of this widening.

    # x_last forecast operator (acts on slab cols [0:D])
    FtopPad = jnp.zeros((LANE, M * D), f32).at[:D, :].set(Fcols)

    # Conv_Wight-weighted squared-norm selector -> lanes (m, w), duplicated halves.
    wn = conv_w.astype(f32).reshape(-1)
    wn = wn / jnp.sum(wn)
    Wsel1 = jnp.einsum('wv,mn,e->wmenv', eyeW, eyeM, wn * wn).reshape(W * M * D, MW)
    Wsel = jnp.concatenate([Wsel1, Wsel1], axis=1)                      # (W*M*D, 2*MW)

    # sum-over-models operator (score normalization), block-diag over the halves.
    Qden1 = jnp.einsum('mn,wv->mwnv', jnp.ones((M, M), f32), eyeW).reshape(MW, MW)
    Qden = jnp.kron(jnp.eye(2, dtype=f32), Qden1)                       # (2*MW, 2*MW)

    # FLS quadratic-form operators, fused:  e = [score^2 | score] @ [A ; -2B] + c
    # (expanded form == Σ (score-c)^2/(2 s^2); safe at these widths — review #2)
    i2s = 1.0 / (2.0 * fls_s.astype(f32) ** 2)                          # (R, W)
    cW = fls_c.astype(f32)
    Afls = jnp.einsum('mn,rw->mwnr', eyeM, i2s).reshape(MW, M * R)
    Bfls = jnp.einsum('mn,rw->mwnr', eyeM, cW * i2s).reshape(MW, M * R)
    AB = jnp.concatenate([Afls, -2.0 * Bfls], axis=0)                   # (2*MW, M*R)
    cconst = jnp.tile(jnp.sum(cW * cW * i2s, axis=-1), M)[None, :]      # (1, M*R)

    # fused FLS numerator/denominator operator
    rwv = fls_w.astype(f32).reshape(-1)
    RW1 = jnp.einsum('mn,r->mrn', eyeM, rwv).reshape(M * R, M)
    RW0 = jnp.einsum('mn,r->mrn', eyeM, jnp.ones((R,), f32)).reshape(M * R, M)
    RW = jnp.concatenate([RW1, RW0], axis=1)                            # (M*R, 2*M)

    # final blend operators (output padded to a lane-dense 128-wide slab)
    Expand = jnp.kron(eyeM, jnp.ones((1, D), f32))                      # (M, M*D)
    Sumsel = jnp.zeros((M * D, LANE), f32).at[:, :D].set(jnp.tile(eyeD, (M, 1)))

    # Optional bf16 matmul operands for v6e/v7x (accumulation stays f32).
    mm_dt = jnp.bfloat16 if use_bf16 else f32
    slab_in = slab.astype(mm_dt)
    Gbig_in = Gbig.astype(mm_dt)
    Ftop_in = FtopPad.astype(mm_dt)

    const2 = lambda b: (0, 0)
    out = pl.pallas_call(
        _total_model_kernel,
        out_shape=jax.ShapeDtypeStruct((Bp, LANE), f32),
        grid=(Bp // TB,),
        in_specs=[
            pl.BlockSpec((TB, LANE), lambda b: (b, 0)),                 # merged batch slab
            pl.BlockSpec((LANE, W * M * D), const2),                    # Gbig
            pl.BlockSpec((W * M * D, 2 * MW), const2),                  # Wsel (dup halves)
            pl.BlockSpec((2 * MW, 2 * MW), const2),                     # Qden
            pl.BlockSpec((2 * MW, M * R), const2),                      # AB = [A ; -2B]
            pl.BlockSpec((1, M * R), const2),                           # cconst
            pl.BlockSpec((M * R, 2 * M), const2),                       # RW = [num | den]
            pl.BlockSpec((LANE, M * D), const2),                        # FtopPad
            pl.BlockSpec((M, M * D), const2),                           # Expand
            pl.BlockSpec((M * D, LANE), const2),                        # Sumsel (128 wide)
        ],
        out_specs=pl.BlockSpec((TB, LANE), lambda b: (b, 0)),
        compiler_params=pltpu.CompilerParams(dimension_semantics=("parallel",)),
    )(slab_in, Gbig_in, Wsel, Qden, AB, cconst, RW, Ftop_in, Expand, Sumsel)
    return out[:B, :D].reshape(B, 1, D)


def ref_forward(x_last, Zs, F, conv_w, fls_c, fls_s, fls_w):
    """Pure-JAX mirror of TotalModel.forward for validation."""
    Z = jnp.swapaxes(Zs, -1, -2)                                    # (B, W+1, D)
    Fzs = jnp.einsum("btd,med->bmte", Z, F)                         # (B, M, W+1, D)
    diff = Fzs[:, :, :-1, :] - Z[:, None, 1:, :]                    # (B, M, W, D)
    w = conv_w.reshape(-1)
    rtn = jnp.sqrt(jnp.sum((w * diff / jnp.sum(w)) ** 2, axis=-1))  # (B, M, W)
    score = jax.nn.softmax(-jnp.log(rtn), axis=-2)
    d = score[..., None, :] - fls_c                                 # (B, M, R, W)
    e = jnp.sum(d * d / (2.0 * fls_s ** 2), axis=-1)                # (B, M, R)
    fire = jnp.exp(-e)
    fnorm = fire / jnp.sum(fire, axis=-1, keepdims=True)
    fls_out = jnp.sum(fnorm * fls_w.reshape(-1), axis=-1)           # (B, M)
    match = jax.nn.softmax(fls_out, axis=-1)                        # (B, M)
    x_now = jnp.einsum("bd,med->bme", x_last, F)                    # (B, M, D)
    return jnp.sum(x_now * match[..., None], axis=1)[:, None, :]    # (B, 1, D)


if __name__ == "__main__":
    B, D, W, R, M = 2, 9, 5, 64, 4   # batch, xDim, xWin, rule_num, num movement models

    key = jax.random.PRNGKey(0)
    k_f, k_c, k_s, k_w, k_x, k_z = jax.random.split(key, 6)

    # Deterministic parameter init (synthetic, no checkpoint).
    F = jnp.eye(D, dtype=jnp.float32) + 0.1 * jax.random.normal(k_f, (M, D, D), jnp.float32)
    conv_w = jnp.ones((1, D), jnp.float32)                      # Conv_Wight = ones(xDim)
    fls_c = jax.random.uniform(k_c, (R, W), jnp.float32)        # FLS centers
    fls_s = 0.3 + 0.4 * jax.random.uniform(k_s, (R, W), jnp.float32)  # FLS widths > 0
    fls_w = jax.random.normal(k_w, (R, 1), jnp.float32)         # FLS consequents

    # --- small case (single grid step) ---
    x_last = jax.random.normal(k_x, (B, D), jnp.float32)
    Zs = jax.random.normal(k_z, (B, D, W + 1), jnp.float32)

    out = total_model_forward(x_last, Zs, F, conv_w, fls_c, fls_s, fls_w)
    out = jax.block_until_ready(out)
    ref = ref_forward(x_last, Zs, F, conv_w, fls_c, fls_s, fls_w)
    assert out.shape == (B, 1, D), out.shape
    assert jnp.all(jnp.isfinite(out)), out
    # Tolerance accounts for approximate EUP rsqrt/reciprocals in the normalizations.
    assert jnp.allclose(out, ref, rtol=5e-3, atol=2e-3), (out, ref)

    # --- larger batch: exercises multi-tile grid (>=2 steps, v7x megacore path) ---
    B2 = 48
    k_x2, k_z2 = jax.random.split(jax.random.PRNGKey(1), 2)
    x_last2 = jax.random.normal(k_x2, (B2, D), jnp.float32)
    Zs2 = jax.random.normal(k_z2, (B2, D, W + 1), jnp.float32)
    out2 = jax.block_until_ready(
        total_model_forward(x_last2, Zs2, F, conv_w, fls_c, fls_s, fls_w))
    ref2 = ref_forward(x_last2, Zs2, F, conv_w, fls_c, fls_s, fls_w)
    assert out2.shape == (B2, 1, D), out2.shape
    assert jnp.all(jnp.isfinite(out2)), out2
    assert jnp.allclose(out2, ref2, rtol=1e-2, atol=5e-3), (out2, ref2)

    print("KERNEL_OK")
</pallas_src>

<mosaic_0001>
module attributes {stable_mosaic.version = 11 : i64} {
  func.func @_total_model_kernel(%arg0: i32, %arg1: memref<8x128xf32, #tpu.memory_space<vmem>>, %arg2: memref<128x180xf32, #tpu.memory_space<vmem>>, %arg3: memref<180x40xf32, #tpu.memory_space<vmem>>, %arg4: memref<40x40xf32, #tpu.memory_space<vmem>>, %arg5: memref<40x256xf32, #tpu.memory_space<vmem>>, %arg6: memref<1x256xf32, #tpu.memory_space<vmem>>, %arg7: memref<256x8xf32, #tpu.memory_space<vmem>>, %arg8: memref<128x36xf32, #tpu.memory_space<vmem>>, %arg9: memref<4x36xf32, #tpu.memory_space<vmem>>, %arg10: memref<36x128xf32, #tpu.memory_space<vmem>>, %arg11: memref<8x128xf32, #tpu.memory_space<vmem>>) attributes {dimension_semantics = [#tpu.dimension_semantics<parallel>], iteration_bounds = array<i64: 1>, scalar_prefetch = 0 : i64, scratch_operands = 0 : i64, tpu.core_type = #tpu.core_type<tc>, window_params = [{transform_indices = @transform_0, window_bounds = array<i64: 8, 128>}, {pipeline_mode = #tpu.pipeline_mode<synchronous>, transform_indices = @transform_1, window_bounds = array<i64: 128, 180>}, {pipeline_mode = #tpu.pipeline_mode<synchronous>, transform_indices = @transform_2, window_bounds = array<i64: 180, 40>}, {pipeline_mode = #tpu.pipeline_mode<synchronous>, transform_indices = @transform_3, window_bounds = array<i64: 40, 40>}, {pipeline_mode = #tpu.pipeline_mode<synchronous>, transform_indices = @transform_4, window_bounds = array<i64: 40, 256>}, {pipeline_mode = #tpu.pipeline_mode<synchronous>, transform_indices = @transform_5, window_bounds = array<i64: 1, 256>}, {pipeline_mode = #tpu.pipeline_mode<synchronous>, transform_indices = @transform_6, window_bounds = array<i64: 256, 8>}, {pipeline_mode = #tpu.pipeline_mode<synchronous>, transform_indices = @transform_7, window_bounds = array<i64: 128, 36>}, {pipeline_mode = #tpu.pipeline_mode<synchronous>, transform_indices = @transform_8, window_bounds = array<i64: 4, 36>}, {pipeline_mode = #tpu.pipeline_mode<synchronous>, transform_indices = @transform_9, window_bounds = array<i64: 36, 128>}, {transform_indices = @transform_10, window_bounds = array<i64: 8, 128>}]} {
    %c0 = arith.constant 0 : index
    %c0_0 = arith.constant 0 : index
    %0 = vector.load %arg1[%c0, %c0_0] : memref<8x128xf32, #tpu.memory_space<vmem>>, vector<8x128xf32>
    %c0_1 = arith.constant 0 : index
    %c0_2 = arith.constant 0 : index
    %1 = vector.load %arg8[%c0_1, %c0_2] : memref<128x36xf32, #tpu.memory_space<vmem>>, vector<128x36xf32>
    %cst = arith.constant dense<0.000000e+00> : vector<8x36xf32>
    %2 = tpu.matmul %0, %1, %cst {dimension_numbers = #tpu.dot_dimension_numbers<[1], [0], [0], [1], [0, 0, 1, 1], [], []>} : vector<8x128xf32>, vector<128x36xf32>, vector<8x36xf32> -> vector<8x36xf32>
    %c0_3 = arith.constant 0 : index
    %c0_4 = arith.constant 0 : index
    %3 = vector.load %arg2[%c0_3, %c0_4] : memref<128x180xf32, #tpu.memory_space<vmem>>, vector<128x180xf32>
    %cst_5 = arith.constant dense<0.000000e+00> : vector<8x180xf32>
    %4 = tpu.matmul %0, %3, %cst_5 {dimension_numbers = #tpu.dot_dimension_numbers<[1], [0], [0], [1], [0, 0, 1, 1], [], []>} : vector<8x128xf32>, vector<128x180xf32>, vector<8x180xf32> -> vector<8x180xf32>
    %5 = arith.mulf %4, %4 : vector<8x180xf32>
    %c0_6 = arith.constant 0 : index
    %c0_7 = arith.constant 0 : index
    %6 = vector.load %arg3[%c0_6, %c0_7] : memref<180x40xf32, #tpu.memory_space<vmem>>, vector<180x40xf32>
    %cst_8 = arith.constant dense<0.000000e+00> : vector<8x40xf32>
    %7 = tpu.matmul %5, %6, %cst_8 {dimension_numbers = #tpu.dot_dimension_numbers<[1], [0], [0], [1], [0, 0, 1, 1], [], []>} : vector<8x180xf32>, vector<180x40xf32>, vector<8x40xf32> -> vector<8x40xf32>
    %cst_9 = arith.constant 1.000000e-30 : f32
    %8 = vector.broadcast %cst_9 : f32 to vector<8x40xf32>
    %9 = arith.addf %7, %8 : vector<8x40xf32>
    %10 = math.rsqrt %9 : vector<8x40xf32>
    %c0_10 = arith.constant 0 : index
    %c0_11 = arith.constant 0 : index
    %11 = vector.load %arg4[%c0_10, %c0_11] : memref<40x40xf32, #tpu.memory_space<vmem>>, vector<40x40xf32>
    %cst_12 = arith.constant dense<0.000000e+00> : vector<8x40xf32>
    %12 = tpu.matmul %10, %11, %cst_12 {dimension_numbers = #tpu.dot_dimension_numbers<[1], [0], [0], [1], [0, 0, 1, 1], [], []>} : vector<8x40xf32>, vector<40x40xf32>, vector<8x40xf32> -> vector<8x40xf32>
    %13 = arith.divf %10, %12 : vector<8x40xf32>
    %14 = tpu.iota {dimensions = array<i32: 1>} : vector<8x40xi32>
    %c20_i32 = arith.constant 20 : i32
    %15 = vector.broadcast %c20_i32 : i32 to vector<8x40xi32>
    %16 = arith.cmpi slt, %14, %15 : vector<8x40xi32>
    %cst_13 = arith.constant 1.000000e+00 : f32
    %17 = vector.broadcast %cst_13 : f32 to vector<8x40xf32>
    %18 = arith.select %16, %13, %17 : vector<8x40xi1>, vector<8x40xf32>
    %19 = arith.mulf %13, %18 : vector<8x40xf32>
    %c0_14 = arith.constant 0 : index
    %c0_15 = arith.constant 0 : index
    %20 = vector.load %arg5[%c0_14, %c0_15] : memref<40x256xf32, #tpu.memory_space<vmem>>, vector<40x256xf32>
    %cst_16 = arith.constant dense<0.000000e+00> : vector<8x256xf32>
    %21 = tpu.matmul %19, %20, %cst_16 {dimension_numbers = #tpu.dot_dimension_numbers<[1], [0], [0], [1], [0, 0, 1, 1], [], []>} : vector<8x40xf32>, vector<40x256xf32>, vector<8x256xf32> -> vector<8x256xf32>
    %c0_17 = arith.constant 0 : index
    %c0_18 = arith.constant 0 : index
    %22 = vector.load %arg6[%c0_17, %c0_18] : memref<1x256xf32, #tpu.memory_space<vmem>>, vector<1x256xf32>
    %23 = vector.broadcast %22 : vector<1x256xf32> to vector<8x256xf32>
    %24 = arith.addf %21, %23 : vector<8x256xf32>
    %cst_19 = arith.constant 8.000000e+01 : f32
    %25 = vector.broadcast %cst_19 : f32 to vector<8x256xf32>
    %26 = arith.minimumf %24, %25 : vector<8x256xf32>
    %cst_20 = arith.constant 0.000000e+00 : f32
    %27 = vector.broadcast %cst_20 : f32 to vector<8x256xf32>
    %28 = arith.subf %27, %26 : vector<8x256xf32>
    %29 = math.exp %28 : vector<8x256xf32>
    %c0_21 = arith.constant 0 : index
    %c0_22 = arith.constant 0 : index
    %30 = vector.load %arg7[%c0_21, %c0_22] : memref<256x8xf32, #tpu.memory_space<vmem>>, vector<256x8xf32>
    %cst_23 = arith.constant dense<0.000000e+00> : vector<8x8xf32>
    %31 = tpu.matmul %29, %30, %cst_23 {dimension_numbers = #tpu.dot_dimension_numbers<[1], [0], [0], [1], [0, 0, 1, 1], [], []>} : vector<8x256xf32>, vector<256x8xf32>, vector<8x8xf32> -> vector<8x8xf32>
    %32 = vector.extract_strided_slice %31 {offsets = [0, 0], sizes = [8, 4], strides = [1, 1]} : vector<8x8xf32> to vector<8x4xf32>
    %33 = vector.extract_strided_slice %31 {offsets = [0, 4], sizes = [8, 4], strides = [1, 1]} : vector<8x8xf32> to vector<8x4xf32>
    %34 = tpu.reciprocal %33 {approx = true} : vector<8x4xf32> -> vector<8x4xf32>
    %35 = arith.mulf %32, %34 : vector<8x4xf32>
    %cst_24 = arith.constant dense<0xFF800000> : vector<8xf32>
    %36 = vector.multi_reduction <maximumf>, %35, %cst_24 [1] : vector<8x4xf32> to vector<8xf32>
    %37 = vector.shape_cast %36 : vector<8xf32> to vector<8x1xf32>
    %38 = vector.broadcast %37 : vector<8x1xf32> to vector<8x4xf32>
    %39 = arith.subf %35, %38 : vector<8x4xf32>
    %40 = math.exp %39 : vector<8x4xf32>
    %cst_25 = arith.constant dense<0.000000e+00> : vector<8xf32>
    %41 = vector.multi_reduction <add>, %40, %cst_25 [1] : vector<8x4xf32> to vector<8xf32>
    %42 = vector.shape_cast %41 : vector<8xf32> to vector<8x1xf32>
    %43 = tpu.reciprocal %42 {approx = true} : vector<8x1xf32> -> vector<8x1xf32>
    %44 = vector.broadcast %43 : vector<8x1xf32> to vector<8x4xf32>
    %45 = arith.mulf %40, %44 : vector<8x4xf32>
    %c0_26 = arith.constant 0 : index
    %c0_27 = arith.constant 0 : index
    %46 = vector.load %arg9[%c0_26, %c0_27] : memref<4x36xf32, #tpu.memory_space<vmem>>, vector<4x36xf32>
    %cst_28 = arith.constant dense<0.000000e+00> : vector<8x36xf32>
    %47 = tpu.matmul %45, %46, %cst_28 {dimension_numbers = #tpu.dot_dimension_numbers<[1], [0], [0], [1], [0, 0, 1, 1], [], []>} : vector<8x4xf32>, vector<4x36xf32>, vector<8x36xf32> -> vector<8x36xf32>
    %48 = arith.mulf %47, %2 : vector<8x36xf32>
    %c0_29 = arith.constant 0 : index
    %c0_30 = arith.constant 0 : index
    %49 = vector.load %arg10[%c0_29, %c0_30] : memref<36x128xf32, #tpu.memory_space<vmem>>, vector<36x128xf32>
    %cst_31 = arith.constant dense<0.000000e+00> : vector<8x128xf32>
    %50 = tpu.matmul %48, %49, %cst_31 {dimension_numbers = #tpu.dot_dimension_numbers<[1], [0], [0], [1], [0, 0, 1, 1], [], []>} : vector<8x36xf32>, vector<36x128xf32>, vector<8x128xf32> -> vector<8x128xf32>
    %c0_32 = arith.constant 0 : index
    %c0_33 = arith.constant 0 : index
    %51 = vector.load %arg11[%c0_32, %c0_33] : memref<8x128xf32, #tpu.memory_space<vmem>>, vector<8x128xf32>
    tpu.vector_store %arg11[%c0_32, %c0_33], %50 {strides = array<i32>} : memref<8x128xf32, #tpu.memory_space<vmem>>, vector<8x128xf32>,
    return
  }
  func.func @transform_0(%arg0: i32) -> (i32, i32) {
    %c0_i32 = arith.constant 0 : i32
    %c0_i32_0 = arith.constant 0 : i32
    return %arg0, %c0_i32 : i32, i32
  }
  func.func @transform_1(%arg0: i32) -> (i32, i32) {
    %c0_i32 = arith.constant 0 : i32
    %c0_i32_0 = arith.constant 0 : i32
    %c0_i32_1 = arith.constant 0 : i32
    return %c0_i32, %c0_i32_0 : i32, i32
  }
  func.func @transform_2(%arg0: i32) -> (i32, i32) {
    %c0_i32 = arith.constant 0 : i32
    %c0_i32_0 = arith.constant 0 : i32
    %c0_i32_1 = arith.constant 0 : i32
    return %c0_i32, %c0_i32_0 : i32, i32
  }
  func.func @transform_3(%arg0: i32) -> (i32, i32) {
    %c0_i32 = arith.constant 0 : i32
    %c0_i32_0 = arith.constant 0 : i32
    %c0_i32_1 = arith.constant 0 : i32
    return %c0_i32, %c0_i32_0 : i32, i32
  }
  func.func @transform_4(%arg0: i32) -> (i32, i32) {
    %c0_i32 = arith.constant 0 : i32
    %c0_i32_0 = arith.constant 0 : i32
    %c0_i32_1 = arith.constant 0 : i32
    return %c0_i32, %c0_i32_0 : i32, i32
  }
  func.func @transform_5(%arg0: i32) -> (i32, i32) {
    %c0_i32 = arith.constant 0 : i32
    %c0_i32_0 = arith.constant 0 : i32
    %c0_i32_1 = arith.constant 0 : i32
    return %c0_i32, %c0_i32_0 : i32, i32
  }
  func.func @transform_6(%arg0: i32) -> (i32, i32) {
    %c0_i32 = arith.constant 0 : i32
    %c0_i32_0 = arith.constant 0 : i32
    %c0_i32_1 = arith.constant 0 : i32
    return %c0_i32, %c0_i32_0 : i32, i32
  }
  func.func @transform_7(%arg0: i32) -> (i32, i32) {
    %c0_i32 = arith.constant 0 : i32
    %c0_i32_0 = arith.constant 0 : i32
    %c0_i32_1 = arith.constant 0 : i32
    return %c0_i32, %c0_i32_0 : i32, i32
  }
  func.func @transform_8(%arg0: i32) -> (i32, i32) {
    %c0_i32 = arith.constant 0 : i32
    %c0_i32_0 = arith.constant 0 : i32
    %c0_i32_1 = arith.constant 0 : i32
    return %c0_i32, %c0_i32_0 : i32, i32
  }
  func.func @transform_9(%arg0: i32) -> (i32, i32) {
    %c0_i32 = arith.constant 0 : i32
    %c0_i32_0 = arith.constant 0 : i32
    %c0_i32_1 = arith.constant 0 : i32
    return %c0_i32, %c0_i32_0 : i32, i32
  }
  func.func @transform_10(%arg0: i32) -> (i32, i32) {
    %c0_i32 = arith.constant 0 : i32
    %c0_i32_0 = arith.constant 0 : i32
    return %arg0, %c0_i32 : i32, i32
  }
}

</mosaic_0001>

<bundles_post_ra>
// kernel: tpu_custom_call.1
= control target key start
LH: loop header
LB: loop body
LE: loop exit
PB: predicated region body
PF: predicated region fallthrough
CT: control target
= control target key end

     0   :  { %s1016_s0 = inlined_call_operand.vmem [shape: f32[8,128], index: 0, kind: input, shape index: {}]   ;;  %s1017_s1 = inlined_call_operand.vmem [shape: f32[128,180], index: 1, kind: input, shape index: {}]   ;;  %s1018_s2 = inlined_call_operand.vmem [shape: f32[180,40], index: 2, kind: input, shape index: {}]   ;;  %s1019_s3 = inlined_call_operand.vmem [shape: f32[40,40], index: 3, kind: input, shape index: {}]   ;;  %s1020_s4 = inlined_call_operand.vmem [shape: f32[40,256], index: 4, kind: input, shape index: {}]   ;;  %s1021_s5 = inlined_call_operand.vmem [shape: f32[1,256], index: 5, kind: input, shape index: {}]   ;;  %s1022_s6 = inlined_call_operand.vmem [shape: f32[256,8], index: 6, kind: input, shape index: {}]   ;;  %s1023_s7 = inlined_call_operand.vmem [shape: f32[128,36], index: 7, kind: input, shape index: {}]   ;;  %s1024_s8 = inlined_call_operand.vmem [shape: f32[4,36], index: 8, kind: input, shape index: {}]   ;;  %s1025_s9 = inlined_call_operand.vmem [shape: f32[36,128], index: 9, kind: input, shape index: {}]   ;;  %s1026_s10 = inlined_call_operand.hbm [shape: f32[8,128], index: 10, kind: output, shape index: {}]  }
   0x1   :  { %v103_v0 = vld [vmem:[%s1017_s1 + $0xf0] sm:$0xff]  ;;  %v101_v1 = vld [vmem:[%s1017_s1 + $0xe0] sm:$0xff]  ;;  %v104_v2 = vld [vmem:[%s1017_s1 + $0xf8] sm:$0xff] }
   0x2   :  { %105 = vmatpush.msra.mxu1 %v103_v0  ;;  %125 = vmatpush.msra.mxu2 %v104_v2  ;;  %v102_v3 = vld [vmem:[%s1017_s1 + $0xe8] sm:$0xff]  ;;  %v99_v4 = vld [vmem:[%s1017_s1 + $0xd0] sm:$0xff]  ;;  %v100_v5 = vld [vmem:[%s1017_s1 + $0xd8] sm:$0xff] }
   0x3   :  { %v97_v6 = vld [vmem:[%s1017_s1 + $0xc0] sm:$0xff]  ;;  %v98_v7 = vld [vmem:[%s1017_s1 + $0xc8] sm:$0xff]  ;;  %v95_v8 = vld [vmem:[%s1017_s1 + $0xb0] sm:$0xff] }
   0x4   :  { %106 = vmatpush.msra.mxu1 %v101_v1  ;;  %126 = vmatpush.msra.mxu2 %v102_v3  ;;  %v96_v9 = vld [vmem:[%s1017_s1 + $0xb8] sm:$0xff]  ;;  %v93_v10 = vld [vmem:[%s1017_s1 + $0xa0] sm:$0xff]  ;;  %v94_v11 = vld [vmem:[%s1017_s1 + $0xa8] sm:$0xff] }
   0x5   :  { %v91_v12 = vld [vmem:[%s1017_s1 + $0x90] sm:$0xff]  ;;  %v92_v13 = vld [vmem:[%s1017_s1 + $0x98] sm:$0xff]  ;;  %v89_v16 = vld [vmem:[%s1017_s1 + $0x80] sm:$0xff] }
   0x6   :  { %107 = vmatpush.msra.mxu1 %v99_v4  ;;  %127 = vmatpush.msra.mxu2 %v100_v5  ;;  %v52_v14 = vld [vmem:[%s1023_s7 + $0x78] sm:$0xff]  ;;  %v51_v15 = vld [vmem:[%s1023_s7 + $0x70] sm:$0xff]  ;;  %v90_v17 = vld [vmem:[%s1017_s1 + $0x88] sm:$0xff] }
   0x7   :  { %53 = vmatpush.msra.mxu0 %v52_v14  ;;  %v162_v18 = vld [vmem:[%s1018_s2 + $0x78] sm:$0xff]  ;;  %v50_v19 = vld [vmem:[%s1023_s7 + $0x68] sm:$0xff]  ;;  %v161_v20 = vld [vmem:[%s1018_s2 + $0x70] sm:$0xff] }
   0x8   :  { %108 = vmatpush.msra.mxu1 %v97_v6  ;;  %128 = vmatpush.msra.mxu2 %v98_v7  ;;  %v87_v21 = vld [vmem:[%s1017_s1 + $0x70] sm:$0xff]  ;;  %v88_v22 = vld [vmem:[%s1017_s1 + $0x78] sm:$0xff]  ;;  %v49_v23 = vld [vmem:[%s1023_s7 + $0x60] sm:$0xff] }
   0x9   :  { %54 = vmatpush.msra.mxu0 %v51_v15  ;;  %178 = vmatpush.msra.mxu3 %v162_v18  ;;  %v160_v24 = vld [vmem:[%s1018_s2 + $0x68] sm:$0xff]  ;;  %v85_v25 = vld [vmem:[%s1017_s1 + $0x60] sm:$0xff]  ;;  %v48_v27 = vld [vmem:[%s1023_s7 + $0x58] sm:$0xff] }
   0xa   :  { %109 = vmatpush.msra.mxu1 %v95_v8  ;;  %129 = vmatpush.msra.mxu2 %v96_v9  ;;  %v86_v26 = vld [vmem:[%s1017_s1 + $0x68] sm:$0xff]  ;;  %v159_v28 = vld [vmem:[%s1018_s2 + $0x60] sm:$0xff]  ;;  %v83_v29 = vld [vmem:[%s1017_s1 + $0x50] sm:$0xff] }
   0xb   :  { %55 = vmatpush.msra.mxu0 %v50_v19  ;;  %179 = vmatpush.msra.mxu3 %v161_v20  ;;  %v84_v30 = vld [vmem:[%s1017_s1 + $0x58] sm:$0xff]  ;;  %v47_v31 = vld [vmem:[%s1023_s7 + $0x50] sm:$0xff]  ;;  %v81_v33 = vld [vmem:[%s1017_s1 + $0x40] sm:$0xff] }
   0xc   :  { %110 = vmatpush.msra.mxu1 %v93_v10  ;;  %130 = vmatpush.msra.mxu2 %v94_v11  ;;  %v158_v32 = vld [vmem:[%s1018_s2 + $0x58] sm:$0xff]  ;;  %v82_v34 = vld [vmem:[%s1017_s1 + $0x48] sm:$0xff]  ;;  %v157_v36 = vld [vmem:[%s1018_s2 + $0x50] sm:$0xff] }
   0xd   :  { %56 = vmatpush.msra.mxu0 %v49_v23  ;;  %180 = vmatpush.msra.mxu3 %v160_v24  ;;  %v46_v35 = vld [vmem:[%s1023_s7 + $0x48] sm:$0xff] }
   0xe   :  { %111 = vmatpush.msra.mxu1 %v91_v12  ;;  %131 = vmatpush.msra.mxu2 %v92_v13 }
   0xf   :  { %57 = vmatpush.msra.mxu0 %v48_v27  ;;  %181 = vmatpush.msra.mxu3 %v159_v28 }
  0x10   :  { %112 = vmatpush.msra.mxu1 %v89_v16  ;;  %132 = vmatpush.msra.mxu2 %v90_v17 }
  0x12   :  { %113 = vmatpush.msra.mxu1 %v87_v21  ;;  %133 = vmatpush.msra.mxu2 %v88_v22 }
  0x14   :  { %114 = vmatpush.msra.mxu1 %v85_v25  ;;  %134 = vmatpush.msra.mxu2 %v86_v26 }
  0x16   :  { %115 = vmatpush.msra.mxu1 %v83_v29  ;;  %135 = vmatpush.msra.mxu2 %v84_v30 }
  0x17   :  { %15 = vsyncpa [#allocation3], 0  ;;  %v79_v37 = vld [vmem:[%s1017_s1 + $0x30] sm:$0xff]  ;;  %v80_v38 = vld [vmem:[%s1017_s1 + $0x38] sm:$0xff]  ;;  %58 = vmatpush.msra.mxu0 %v47_v31  ;;  %182 = vmatpush.msra.mxu3 %v158_v32  ;;  %vm174_vm0 = vcmask 1043456   ;;  %vm170_vm1 = vcmask 424960  }
  0x18   :  { %116 = vmatpush.msra.mxu1 %v81_v33  ;;  %136 = vmatpush.msra.mxu2 %v82_v34  ;;  %v45_v39 = vld [vmem:[%s1023_s7 + $0x40] sm:$0xff]  ;;  %v156_v40 = vld [vmem:[%s1018_s2 + $0x48] sm:$0xff]  ;;  %v44_v43 = vld [vmem:[%s1023_s7 + $0x38] sm:$0xff]  ;;  %vm233_vm4 = vcmask 326656   ;;  %vm422_vm11 = vcmask 31744   ;;  %vm467_vm12 = vcmask 293888  }
  0x19   :  { %v77_v41 = vld [vmem:[%s1017_s1 + $0x20] sm:$0xff]  ;;  %v78_v42 = vld [vmem:[%s1017_s1 + $0x28] sm:$0xff]  ;;  %59 = vmatpush.msra.mxu0 %v46_v35  ;;  %183 = vmatpush.msra.mxu3 %v157_v36  ;;  %v75_v45 = vld [vmem:[%s1017_s1 + $0x10] sm:$0xff]  ;;  %s563_s15 = smov [#allocation2]   ;;  %s502_s18 = sshll.u32 %s1026_s10, 4  ;;  %s503_s18 = int_to_ptr.hbm [resolvable:$true] %s502_s18 }
  0x1a   :  { %117 = vmatpush.msra.mxu1 %v79_v37  ;;  %137 = vmatpush.msra.mxu2 %v80_v38  ;;  %v155_v44 = vld [vmem:[%s1018_s2 + $0x40] sm:$0xff]  ;;  %v76_v46 = vld [vmem:[%s1017_s1 + $0x18] sm:$0xff]  ;;  %v43_v47 = vld [vmem:[%s1023_s7 + $0x30] sm:$0xff] }
  0x1b   :  { %60 = vmatpush.msra.mxu0 %v45_v39  ;;  %184 = vmatpush.msra.mxu3 %v156_v40  ;;  %v154_v48 = vld [vmem:[%s1018_s2 + $0x38] sm:$0xff]  ;;  %v73_v49 = vld [vmem:[%s1017_s1] sm:$0xff]  ;;  %v74_v50 = vld [vmem:[%s1017_s1 + $0x8] sm:$0xff] }
  0x1c   :  { %118 = vmatpush.msra.mxu1 %v77_v41  ;;  %138 = vmatpush.msra.mxu2 %v78_v42  ;;  %v36_v51 = vld [vmem:[%s1016_s0] sm:$0xff]  ;;  %v42_v52 = vld [vmem:[%s1023_s7 + $0x28] sm:$0xff]  ;;  %v153_v53 = vld [vmem:[%s1018_s2 + $0x30] sm:$0xff] }
  0x1d   :  { %61 = vmatpush.msra.mxu0 %v44_v43  ;;  %185 = vmatpush.msra.mxu3 %v155_v44  ;;  %v41_v54 = vld [vmem:[%s1023_s7 + $0x20] sm:$0xff]  ;;  %v152_v55 = vld [vmem:[%s1018_s2 + $0x28] sm:$0xff]  ;;  %v40_v56 = vld [vmem:[%s1023_s7 + $0x18] sm:$0xff] }
  0x1e   :  { %119 = vmatpush.msra.mxu1 %v75_v45  ;;  %139 = vmatpush.msra.mxu2 %v76_v46  ;;  %v151_v57 = vld [vmem:[%s1018_s2 + $0x20] sm:$0xff]  ;;  %v39_v58 = vld [vmem:[%s1023_s7 + $0x10] sm:$0xff]  ;;  %v150_v59 = vld [vmem:[%s1018_s2 + $0x18] sm:$0xff] }
  0x1f   :  { %62 = vmatpush.msra.mxu0 %v43_v47  ;;  %186 = vmatpush.msra.mxu3 %v154_v48  ;;  %v38_v60 = vld [vmem:[%s1023_s7 + $0x8] sm:$0xff]  ;;  %v149_v61 = vld [vmem:[%s1018_s2 + $0x10] sm:$0xff]  ;;  %v37_v62 = vld [vmem:[%s1023_s7] sm:$0xff] }
  0x20   :  { %120 = vmatpush.msra.mxu1 %v73_v49  ;;  %140 = vmatpush.msra.mxu2 %v74_v50  ;;  %v169_v63 = vld [vmem:[%s1018_s2 + $0xb0] sm:$0xf]  ;;  %v148_v0 = vld [vmem:[%s1018_s2 + $0x8] sm:$0xff]  ;;  %v147_v2 = vld [vmem:[%s1018_s2] sm:$0xff] }
  0x21   :  { %121 = vmatmul.f32.vlgmr.msra.gmra.mxu1 %v36_v51  ;;  %141 = vmatmul.f32.vlgmr.msra.gmra.mxu2 %v36_v51  ;;  %v168_v1 = vld [vmem:[%s1018_s2 + $0xa8] sm:$0xff]  ;;  %v167_v3 = vld [vmem:[%s1018_s2 + $0xa0] sm:$0xff]  ;;  %v166_v4 = vld [vmem:[%s1018_s2 + $0x98] sm:$0xff] }
  0x22   :  { %63 = vmatpush.msra.mxu0 %v42_v52  ;;  %187 = vmatpush.msra.mxu3 %v153_v53  ;;  %v165_v5 = vld [vmem:[%s1018_s2 + $0x90] sm:$0xff]  ;;  %v164_v6 = vld [vmem:[%s1018_s2 + $0x88] sm:$0xff]  ;;  %v163_v7 = vld [vmem:[%s1018_s2 + $0x80] sm:$0xff]  ;;  %s500_s2 = sshll.u32 %s563_s15, 4  ;;  %s501_s2 = int_to_ptr.vmem [resolvable:$true] %s500_s2 }
  0x23   :  { %v232_v12 = vld [vmem:[%s1019_s3 + $0x20] sm:$0xff]  ;;  %v231_v13 = vld [vmem:[%s1019_s3 + $0x18] sm:$0xff]  ;;  %v230_v14 = vld [vmem:[%s1019_s3 + $0x10] sm:$0xff] }
  0x24   :  { %64 = vmatpush.msra.mxu0 %v41_v54  ;;  %188 = vmatpush.msra.mxu3 %v152_v55  ;;  %v229_v15 = vld [vmem:[%s1019_s3 + $0x8] sm:$0xff]  ;;  %v228_v16 = vld [vmem:[%s1019_s3] sm:$0xff]  ;;  %v283_v31 = vld [vmem:[%s1020_s4 + $0x30] sm:$0xff]  ;;  %v272_v55 = vlaneseq }
  0x25   :  { %v285_v29 = vld [vmem:[%s1020_s4 + $0x40] sm:$0xff]  ;;  %v286_v30 = vld [vmem:[%s1020_s4 + $0x48] sm:$0xff]  ;;  %v284_v32 = vld [vmem:[%s1020_s4 + $0x38] sm:$0xff] }
  0x26   :  { %65 = vmatpush.msra.mxu0 %v40_v56  ;;  %189 = vmatpush.msra.mxu3 %v151_v57  ;;  %v281_v33 = vld [vmem:[%s1020_s4 + $0x20] sm:$0xff]  ;;  %v282_v34 = vld [vmem:[%s1020_s4 + $0x28] sm:$0xff]  ;;  %v279_v35 = vld [vmem:[%s1020_s4 + $0x10] sm:$0xff] }
  0x27   :  { %v280_v36 = vld [vmem:[%s1020_s4 + $0x18] sm:$0xff]  ;;  %v277_v37 = vld [vmem:[%s1020_s4] sm:$0xff]  ;;  %v278_v38 = vld [vmem:[%s1020_s4 + $0x8] sm:$0xff] }
  0x28   :  { %66 = vmatpush.msra.mxu0 %v39_v58  ;;  %190 = vmatpush.msra.mxu3 %v150_v59  ;;  %v359_v39 = vld [vmem:[%s1022_s6 + $0x78] sm:$0xff]  ;;  %v358_v40 = vld [vmem:[%s1022_s6 + $0x70] sm:$0xff]  ;;  %v357_v42 = vld [vmem:[%s1022_s6 + $0x68] sm:$0xff] }
  0x29   :  { %376 = vmatpush.msrb.mxu1 %v359_v39  ;;  %v375_v41 = vld [vmem:[%s1022_s6 + $0xf8] sm:$0xff]  ;;  %v374_v43 = vld [vmem:[%s1022_s6 + $0xf0] sm:$0xff]  ;;  %v373_v44 = vld [vmem:[%s1022_s6 + $0xe8] sm:$0xff] }
  0x2a   :  { %67 = vmatpush.msra.mxu0 %v38_v60  ;;  %191 = vmatpush.msra.mxu3 %v149_v61  ;;  %v356_v45 = vld [vmem:[%s1022_s6 + $0x60] sm:$0xff]  ;;  %v355_v47 = vld [vmem:[%s1022_s6 + $0x58] sm:$0xff]  ;;  %v354_v49 = vld [vmem:[%s1022_s6 + $0x50] sm:$0xff]  ;;  %v273_v60 = vand.u32 127, %v272_v55 }
  0x2b   :  { %396 = vmatpush.msrb.mxu2 %v375_v41  ;;  %377 = vmatpush.msrb.mxu1 %v358_v40  ;;  %v372_v46 = vld [vmem:[%s1022_s6 + $0xe0] sm:$0xff]  ;;  %v371_v48 = vld [vmem:[%s1022_s6 + $0xd8] sm:$0xff] }
  0x2c   :  { %68 = vmatpush.msra.mxu0 %v37_v62  ;;  %192 = vmatpush.msra.mxu3 %v148_v0  ;;  %v352_v52 = vld [vmem:[%s1022_s6 + $0x40] sm:$0xff]  ;;  %vm274_vm10 = vcmp.lt.s32.totalorder %v273_v60, 20 }
  0x2d   :  { %69 = vmatmul.f32.vlgmr.msra.gmra.mxu0 %v36_v51  ;;  %397 = vmatpush.msrb.mxu2 %v374_v43  ;;  %v353_v51 = vld [vmem:[%s1022_s6 + $0x48] sm:$0xff] }
  0x2e   :  { %511 = vmatpush.msk.msrb.mxu0 %vm174_vm0, %v169_v63  ;;  %193 = vmatpush.msra.mxu3 %v147_v2 }
  0x2f   :  { %378 = vmatpush.msrb.mxu1 %v357_v42  ;;  %398 = vmatpush.msrb.mxu2 %v373_v44 }
  0x30   :  { %208 = vmatpush.msrb.mxu0 %v168_v1  ;;  %248 = vmatpush.msrb.mxu3 %v232_v12  ;;  %v347_v12 = vld [vmem:[%s1022_s6 + $0x18] sm:$0xff] }
  0x31   :  { %379 = vmatpush.msrb.mxu1 %v356_v45  ;;  %399 = vmatpush.msrb.mxu2 %v372_v46 }
  0x32   :  { %209 = vmatpush.msrb.mxu0 %v167_v3  ;;  %249 = vmatpush.msrb.mxu3 %v231_v13  ;;  %v366_v13 = vld [vmem:[%s1022_s6 + $0xb0] sm:$0xff] }
  0x33   :  { %380 = vmatpush.msrb.mxu1 %v355_v47  ;;  %400 = vmatpush.msrb.mxu2 %v371_v48 }
  0x34   :  { %210 = vmatpush.msrb.mxu0 %v166_v4  ;;  %250 = vmatpush.msrb.mxu3 %v230_v14  ;;  %v351_v4 = vld [vmem:[%s1022_s6 + $0x38] sm:$0xff]  ;;  %v346_v14 = vld [vmem:[%s1022_s6 + $0x10] sm:$0xff] }
  0x35   :  { %381 = vmatpush.msrb.mxu1 %v354_v49 }
  0x36   :  { %211 = vmatpush.msrb.mxu0 %v165_v5  ;;  %251 = vmatpush.msrb.mxu3 %v229_v15  ;;  %v370_v5 = vld [vmem:[%s1022_s6 + $0xd0] sm:$0xff]  ;;  %v365_v15 = vld [vmem:[%s1022_s6 + $0xa8] sm:$0xff] }
  0x37   :  { %382 = vmatpush.msrb.mxu1 %v353_v51  ;;  %401 = vmatpush.msrb.mxu2 %v370_v5  ;;  %v434_v51 = vld [vmem:[%s1024_s8] sm:$0xf] }
  0x38   :  { %212 = vmatpush.msrb.mxu0 %v164_v6  ;;  %252 = vmatpush.msrb.mxu3 %v228_v16  ;;  %v350_v6 = vld [vmem:[%s1022_s6 + $0x30] sm:$0xff]  ;;  %v345_v16 = vld [vmem:[%s1022_s6 + $0x8] sm:$0xff] }
  0x39   :  { %383 = vmatpush.msrb.mxu1 %v352_v52  ;;  %v466_v52 = vld [vmem:[%s1025_s9 + $0x20] sm:$0xf] }
  0x3a   :  { %213 = vmatpush.msrb.mxu0 %v163_v7  ;;  %v369_v7 = vld [vmem:[%s1022_s6 + $0xc8] sm:$0xff] }
  0x3b   :  { %384 = vmatpush.msrb.mxu1 %v351_v4  ;;  %402 = vmatpush.msrb.mxu2 %v369_v7 }
  0x3c   :  { %307 = vmatpush.msra.mxu0 %v285_v29 }
  0x3d   :  { %385 = vmatpush.msrb.mxu1 %v350_v6 }
  0x3e   :  { %308 = vmatpush.msra.mxu0 %v283_v31 }
  0x40   :  { %309 = vmatpush.msra.mxu0 %v281_v33 }
  0x42   :  { %310 = vmatpush.msra.mxu0 %v279_v35 }
  0x44   :  { %311 = vmatpush.msra.mxu0 %v277_v37 }
  0x9e   :  { %v122_v8 = vpop.f32.mrf.mxu1 }
  0x9f   :  { %v145_v9 = vmul.f32 %v122_v8, %v122_v8  ;;  %v349_v8 = vld [vmem:[%s1022_s6 + $0x28] sm:$0xff] }
  0xa0   :  { %386 = vmatpush.msrb.mxu1 %v349_v8 }
  0xa1   :  { %194 = vmatmul.f32.vlgmr.msra.gmra.mxu3 %v145_v9  ;;  %v368_v9 = vld [vmem:[%s1022_s6 + $0xc0] sm:$0xff] }
  0xa2   :  { %327 = vmatpush.msra.mxu3 %v286_v30  ;;  %403 = vmatpush.msrb.mxu2 %v368_v9 }
  0xa4   :  { %v142_v10 = vpop.f32.mrf.mxu2  ;;  %328 = vmatpush.msra.mxu3 %v284_v32 }
  0xa5   :  { %v146_v11 = vmul.f32 %v142_v10, %v142_v10  ;;  %v348_v10 = vld [vmem:[%s1022_s6 + $0x20] sm:$0xff] }
  0xa6   :  { %329 = vmatpush.msra.mxu3 %v282_v34  ;;  %387 = vmatpush.msrb.mxu1 %v348_v10 }
  0xa7   :  { %512 = vmatmul.msk.f32.vlgmr.msrb.gmra.mxu0 %vm170_vm1, %v146_v11  ;;  %v367_v11 = vld [vmem:[%s1022_s6 + $0xb8] sm:$0xff] }
  0xa8   :  { %330 = vmatpush.msra.mxu3 %v280_v36  ;;  %404 = vmatpush.msrb.mxu2 %v367_v11 }
  0xa9   :  { %388 = vmatpush.msrb.mxu1 %v347_v12  ;;  %518 = vmatpush.msk.msrb.mxu0 %vm174_vm0, %v466_v52 }
  0xaa   :  { %v851_v17 = vpop.f32.mrf.mxu0  ;;  %331 = vmatpush.msra.mxu3 %v278_v38  ;;  %405 = vmatpush.msrb.mxu2 %v366_v13 }
  0xab   :  { %389 = vmatpush.msrb.mxu1 %v346_v14 }
  0xac   :  { %406 = vmatpush.msrb.mxu2 %v365_v15 }
  0xad   :  { %390 = vmatpush.msrb.mxu1 %v345_v16 }
 0x124   :  { %v195_v18 = vpop.f32.mrf.mxu3  ;;  %v215_v19 = vpop.f32.mrf.mxu0 }
 0x125   :  { %v196_v20 = vadd.f32 1e-30, %v195_v18  ;;  %v364_v18 = vld [vmem:[%s1022_s6 + $0xa0] sm:$0xff] }
 0x126   :  { %407 = vmatpush.msrb.mxu2 %v364_v18 }
 0x127   :  { %v216_v21 = vadd.f32 %v215_v19, %v196_v20  ;;  %v344_v19 = vld [vmem:[%s1022_s6] sm:$0xff]  ;;  %v363_v20 = vld [vmem:[%s1022_s6 + $0x98] sm:$0xff] }
 0x128   :  { %391 = vmatpush.msrb.mxu1 %v344_v19  ;;  %408 = vmatpush.msrb.mxu2 %v363_v20 }
 0x129   :  { %522 = vrsqrt.f32 %v216_v21  ;;  %vm224_vm3 = vweird.f32 %v216_v21 }
 0x12f   :  { %v523_v22 = vpop.eup %522 }
 0x130   :  { %v219_v23 = vmul.f32 %v523_v22, %v216_v21  ;;  %vm225_vm2 = vweird.f32 %v523_v22  ;;  %v362_v21 = vld [vmem:[%s1022_s6 + $0x90] sm:$0xff] }
 0x131   :  { %vm226_vm5 = vmor %vm224_vm3, %vm225_vm2  ;;  %409 = vmatpush.msrb.mxu2 %v362_v21 }
 0x132   :  { %v220_v24 = vmul.f32 %v523_v22, %v219_v23  ;;  %v360_v23 = vld [vmem:[%s1022_s6 + $0x80] sm:$0xff] }
 0x134   :  { %v221_v25 = vmul.f32 0.5, %v220_v24  ;;  %v287_v24 = vld [vmem:[%s1021_s5] sm:$0x3]  ;;  %s562_s5 = smov 124  }
 0x135   :  { %v290_v29 = vperm.slane %v287_v24, 1 }
 0x136   :  { %v222_v26 = vsub.f32 1.5, %v221_v25  ;;  %v289_v25 = vperm.slane %v287_v24, 0 }
 0x138   :  { %v223_v27 = vmul.f32 %v523_v22, %v222_v26 }
 0x13a   :  { %v853_v28 = vsel %vm226_vm5, %v523_v22, %v223_v27  ;;  %v361_v22 = vld [vmem:[%s1022_s6 + $0x88] sm:$0xff] }
 0x13b   :  { %513 = vmatmul.msk.f32.vlgmr.msrb.gmra.mxu3 %vm233_vm4, %v853_v28  ;;  %410 = vmatpush.msrb.mxu2 %v361_v22 }
 0x13c   :  { %516 = vmatpush.msk.msrb.mxu3 %vm174_vm0, %v434_v51 }
 0x13d   :  { %411 = vmatpush.msrb.mxu2 %v360_v23 }
 0x1be   :  { %v254_v50 = vpop.f32.mrf.mxu3 }
 0x1bf   :  { %524 = vrcp.f32 %v254_v50  ;;  %v268_v57 = vand.u32 2147483648, %v254_v50  ;;  %v266_v59 = vand.u32 2147483647, %v254_v50  ;;  %vm262_vm7 = vweird.f32 %v254_v50 }
 0x1c1   :  { %v269_v62 = vor.u32 1.1754944e-38, %v268_v57  ;;  %vm267_vm9 = vcmp.eq.f32.partialorder %v266_v59, 8.507059e+37  ;;  %v462_v59 = vld [vmem:[%s1025_s9] sm:$0xff] }
 0x1c5   :  { %v525_v53 = vpop.eup %524 }
 0x1c6   :  { %v258_v54 = vmul.f32 %v525_v53, %v254_v50  ;;  %vm263_vm6 = vweird.f32 %v525_v53 }
 0x1c7   :  { %vm264_vm8 = vmor %vm262_vm7, %vm263_vm6 }
 0x1c8   :  { %v259_v56 = vsub.f32 1.0, %v258_v54  ;;  %v464_v54 = vld [vmem:[%s1025_s9 + $0x10] sm:$0xff] }
 0x1ca   :  { %v260_v58 = vmul.f32 %v525_v53, %v259_v56 }
 0x1cc   :  { %v261_v61 = vadd.f32 %v525_v53, %v260_v58  ;;  %v463_v58 = vld [vmem:[%s1025_s9 + $0x8] sm:$0xff] }
 0x1ce   :  { %v265_v63 = vsel %vm264_vm8, %v525_v53, %v261_v61  ;;  %v465_v53 = vld [vmem:[%s1025_s9 + $0x18] sm:$0xff] }
 0x1cf   :  { %v270_v0 = vsel %vm267_vm9, %v269_v62, %v265_v63  ;;  %486 = vmatpush.msrb.mxu0 %v465_v53 }
 0x1d0   :  { %v271_v1 = vmul.f32 %v270_v0, %v853_v28 }
 0x1d1   :  { %487 = vmatpush.msrb.mxu0 %v464_v54 }
 0x1d2   :  { %v275_v2 = vsel %vm274_vm10, %v271_v1, 1.0 }
 0x1d3   :  { %v276_v3 = vmul.f32 %v275_v2, %v271_v1  ;;  %488 = vmatpush.msrb.mxu0 %v463_v58 }
 0x1d5   :  { %514 = vmatmul.msk.f32.vlgmr.msra.gmra.mxu0 %vm233_vm4, %v276_v3  ;;  %515 = vmatmul.msk.f32.vlgmr.msra.gmra.mxu3 %vm233_vm4, %v276_v3 }
 0x1d6   :  { %489 = vmatpush.msrb.mxu0 %v462_v59 }
 0x252   :  { %v313_v26 = vpop.f32.mrf.mxu0 }
 0x253   :  { %v314_v27 = vadd.f32 %v313_v26, %v289_v25 }
 0x255   :  { %v336_v28 = vmin.f32 %v314_v27, 80.0 }
 0x257   :  { %v338_v30 = vsub.f32 0.0, %v336_v28 }
 0x258   :  { %v333_v31 = vpop.f32.mrf.mxu3 }
 0x259   :  { %v340_v32 = vmul.f32 1.442695, %v338_v30  ;;  %v334_v33 = vadd.f32 %v333_v31, %v290_v29 }
 0x25b   :  { %526 = vpow2.f32 %v340_v32  ;;  %v337_v34 = vmin.f32 %v334_v33, 80.0 }
 0x25d   :  { %v339_v35 = vsub.f32 0.0, %v337_v34 }
 0x25f   :  { %v342_v36 = vmul.f32 1.442695, %v339_v35 }
 0x261   :  { %v527_v37 = vpop.eup %526  ;;  %528 = vpow2.f32 %v342_v36 }
 0x262   :  { %392 = vmatmul.f32.vlgmr.msrb.gmra.mxu1 %v527_v37 }
 0x267   :  { %v529_v38 = vpop.eup %528 }
 0x268   :  { %412 = vmatmul.f32.vlgmr.msrb.gmra.mxu2 %v529_v38 }
 0x2df   :  { %v393_v39 = vpop.f32.mrf.mxu1 }
 0x2eb   :  { %v413_v40 = vpop.f32.mrf.mxu2 }
 0x2ec   :  { %v414_v41 = vadd.f32 %v413_v40, %v393_v39 }
 0x2ee   :  { %530 = vrcp.f32 %v414_v41 }
 0x2f4   :  { %v531_v42 = vpop.eup %530 }
 0x2f5   :  { %418 = vrot.lane.b32.xlu0 %v531_v42, %s562_s5 }
 0x367   :  { %v419_v43 = vpop.permute.xlu0 %418 }
 0x368   :  { %v421_v44 = vmul.f32 %v419_v43, %v414_v41 }
 0x36a   :  { %v423_v45 = vsel %vm422_vm11, %v421_v44, -inf }
 0x36b   :  { %424 = vmax.xlane.f32.xlu0 %v423_v45 }
 0x3de   :  { %v425_v46 = vpop.xlane.xlu0 %424 }
 0x3df   :  { %v426_v47 = vsub.f32 %v421_v44, %v425_v46 }
 0x3e1   :  { %v427_v48 = vmul.f32 1.442695, %v426_v47 }
 0x3e3   :  { %532 = vpow2.f32 %v427_v48 }
 0x3e9   :  { %v533_v49 = vpop.eup %532 }
 0x3ea   :  { %v429_v50 = vsel %vm422_vm11, %v533_v49, 0.0 }
 0x3eb   :  { %430 = vadd.xlane.f32.xlu1 %v429_v50 }
 0x45e   :  { %v431_v55 = vpop.xlane.xlu1 %430 }
 0x45f   :  { %534 = vrcp.f32 %v431_v55 }
 0x465   :  { %v535_v56 = vpop.eup %534 }
 0x466   :  { %v433_v57 = vmul.f32 %v535_v56, %v533_v49 }
 0x468   :  { %517 = vmatmul.msk.f32.vlgmr.msrb.gmra.mxu3 %vm422_vm11, %v433_v57 }
 0x4eb   :  { %v458_v60 = vpop.f32.mrf.mxu3 }
 0x4ec   :  { %v461_v61 = vmul.f32 %v458_v60, %v851_v17 }
 0x4ee   :  { %519 = vmatmul.msk.f32.vlgmr.msrb.gmra.mxu0 %vm467_vm12, %v461_v61 }
 0x56b   :  { %v491_v62 = vpop.f32.mrf.mxu0 }
 0x56c   :  { %494 = vst [vmem:[#allocation2] sm:$0xff] %v491_v62 }
 0x56d   :  { %505 = dma.vmem_to_hbm [thread:$0]  %s501_s2, 128, %s503_s18, [#allocation3]  }
 0x56e   :  { %560 = dma.done.wait [#allocation3], 128  }
 0x56f   :  { %561 = vsyncadd [#allocation3], 4294967168 }
 0x570   :  { %510 = vsyncpa [#allocation3], 1 }

</bundles_post_ra>
